<compile_context>
chip_gen: v6e
topology: v6e:2x2x1
jax: 0.10.0
libtpu: 0.0.40
codegen_flags: <defaults>
</compile_context>

<pallas_src>
import jax
import jax.numpy as jnp
from jax.experimental import pallas as pl
from jax.experimental.pallas import tpu as pltpu

BN_EPS = 1e-5
LANE = 128
SUBLANE = 8


def _round_up(n, m):
    return (n + m - 1) // m * m


def feature_kernel(x_ref, w_in_ref, b_in_ref, w_eff_ref, b_eff_ref, out_ref):
    # in_layer: Linear(input_size -> hidden)
    h = jnp.dot(x_ref[...], w_in_ref[...],
                preferred_element_type=jnp.float32) + b_in_ref[...]

    # Per layer (BN already folded into w_eff/b_eff): h = relu(h @ W + b) + h
    n_layers = w_eff_ref.shape[0]
    for l in range(n_layers):  # static unroll; n_layers is small & fixed
        z = jnp.dot(h, w_eff_ref[l],
                    preferred_element_type=jnp.float32) + b_eff_ref[l]
        h = jnp.maximum(z, 0.0) + h

    out_ref[...] = h


def feature_forward(x, params):
    w_in, b_in, ws, bs, gammas, betas, means, varis = params
    B, in_dim = x.shape
    hidden = w_in.shape[1]
    n_layers = ws.shape[0]

    # ---- Fold eval-mode BatchNorm1d into the per-layer Linear (host/XLA side) ----
    inv_std = jax.lax.rsqrt(varis + BN_EPS)          # (L, H)
    scale = gammas * inv_std                         # (L, H)
    w_eff = ws * scale[:, None, :]                   # (L, H, H)
    b_eff = (bs - means) * scale + betas             # (L, H)

    # ---- Pad feature dims to lane multiples (128); tile batch along a grid ----
    in_pad = _round_up(in_dim, LANE)
    h_pad = _round_up(hidden, LANE)
    if B <= LANE:
        tb = _round_up(max(B, SUBLANE), SUBLANE)
        b_pad = tb
    else:
        tb = LANE
        b_pad = _round_up(B, tb)

    f32 = jnp.float32
    xp = jnp.zeros((b_pad, in_pad), f32).at[:B, :in_dim].set(x.astype(f32))
    w_in_p = jnp.zeros((in_pad, h_pad), f32).at[:in_dim, :hidden].set(w_in)
    b_in_p = jnp.zeros((1, h_pad), f32).at[0, :hidden].set(b_in)
    w_eff_p = jnp.zeros((n_layers, h_pad, h_pad), f32).at[:, :hidden, :hidden].set(w_eff)
    b_eff_p = jnp.zeros((n_layers, 1, h_pad), f32).at[:, 0, :hidden].set(b_eff)

    grid = (b_pad // tb,)
    out = pl.pallas_call(
        feature_kernel,
        out_shape=jax.ShapeDtypeStruct((b_pad, h_pad), f32),
        grid_spec=pltpu.PrefetchScalarGridSpec(
            num_scalar_prefetch=0,
            grid=grid,
            in_specs=[
                pl.BlockSpec((tb, in_pad), lambda i: (i, 0)),                 # x tile
                pl.BlockSpec((in_pad, h_pad), lambda i: (0, 0)),              # resident
                pl.BlockSpec((1, h_pad), lambda i: (0, 0)),                   # resident
                pl.BlockSpec((n_layers, h_pad, h_pad), lambda i: (0, 0, 0)),  # resident
                pl.BlockSpec((n_layers, 1, h_pad), lambda i: (0, 0, 0)),      # resident
            ],
            out_specs=pl.BlockSpec((tb, h_pad), lambda i: (i, 0)),
        ),
        compiler_params=pltpu.CompilerParams(
            dimension_semantics=("parallel",),      # shard batch tiles across TCs (v7x)
            vmem_limit_bytes=64 * 1024 * 1024,
        ),
    )(xp, w_in_p, b_in_p, w_eff_p, b_eff_p)

    return out[:B, :hidden]


def make_params(key, input_size, hidden_dim, n_layers):
    ks = jax.random.split(key, 8)
    # in_layer (stored (in, out); math-equivalent to PyTorch's x @ W.T + b)
    w_in = jax.random.normal(ks[0], (input_size, hidden_dim), jnp.float32) * 0.1
    b_in = jax.random.normal(ks[1], (hidden_dim,), jnp.float32) * 0.1
    # per-layer Linear weights / biases, stacked
    ws = jax.random.normal(ks[2], (n_layers, hidden_dim, hidden_dim), jnp.float32) * 0.1
    bs = jax.random.normal(ks[3], (n_layers, hidden_dim), jnp.float32) * 0.1
    # BatchNorm1d affine params + running stats (deterministic, non-trivial)
    gammas = 1.0 + 0.05 * jax.random.normal(ks[4], (n_layers, hidden_dim), jnp.float32)
    betas = 0.05 * jax.random.normal(ks[5], (n_layers, hidden_dim), jnp.float32)
    means = 0.1 * jax.random.normal(ks[6], (n_layers, hidden_dim), jnp.float32)
    varis = 1.0 + 0.1 * jnp.abs(jax.random.normal(ks[7], (n_layers, hidden_dim), jnp.float32))
    return (w_in, b_in, ws, bs, gammas, betas, means, varis)


def feature_reference(x, params):
    # Pure-JAX reference of the UNFOLDED eval-mode forward (matches PyTorch).
    w_in, b_in, ws, bs, gammas, betas, means, varis = params
    h = x @ w_in + b_in
    for l in range(ws.shape[0]):
        z = h @ ws[l] + bs[l]
        z = (z - means[l]) * jax.lax.rsqrt(varis[l] + BN_EPS) * gammas[l] + betas[l]
        h = jnp.maximum(z, 0.0) + h
    return h


if __name__ == "__main__":
    batch = 8
    input_size = 16
    hidden_dim = 32
    n_layers = 3

    key = jax.random.PRNGKey(0)
    k_x, k_p = jax.random.split(key)
    x = jax.random.normal(k_x, (batch, input_size), jnp.float32)
    params = make_params(k_p, input_size, hidden_dim, n_layers)

    out = feature_forward(x, params)
    out = jax.block_until_ready(out)

    ref = feature_reference(x, params)
    assert out.shape == (batch, hidden_dim)
    assert jnp.allclose(out, ref, atol=1e-5, rtol=1e-5), "mismatch vs JAX reference"
    print("KERNEL_OK")
</pallas_src>

<mosaic_0001>
module attributes {stable_mosaic.version = 11 : i64} {
  func.func @feature_kernel(%arg0: i32, %arg1: memref<8x128xf32, #tpu.memory_space<vmem>>, %arg2: memref<128x128xf32, #tpu.memory_space<vmem>>, %arg3: memref<1x128xf32, #tpu.memory_space<vmem>>, %arg4: memref<3x128x128xf32, #tpu.memory_space<vmem>>, %arg5: memref<3x1x128xf32, #tpu.memory_space<vmem>>, %arg6: memref<8x128xf32, #tpu.memory_space<vmem>>) attributes {dimension_semantics = [#tpu.dimension_semantics<parallel>], iteration_bounds = array<i64: 1>, scalar_prefetch = 0 : i64, scratch_operands = 0 : i64, tpu.core_type = #tpu.core_type<tc>, window_params = [{transform_indices = @transform_0, window_bounds = array<i64: 8, 128>}, {pipeline_mode = #tpu.pipeline_mode<synchronous>, transform_indices = @transform_1, window_bounds = array<i64: 128, 128>}, {pipeline_mode = #tpu.pipeline_mode<synchronous>, transform_indices = @transform_2, window_bounds = array<i64: 1, 128>}, {pipeline_mode = #tpu.pipeline_mode<synchronous>, transform_indices = @transform_3, window_bounds = array<i64: 3, 128, 128>}, {pipeline_mode = #tpu.pipeline_mode<synchronous>, transform_indices = @transform_4, window_bounds = array<i64: 3, 1, 128>}, {transform_indices = @transform_5, window_bounds = array<i64: 8, 128>}]} {
    %c0 = arith.constant 0 : index
    %c0_0 = arith.constant 0 : index
    %0 = vector.load %arg1[%c0, %c0_0] : memref<8x128xf32, #tpu.memory_space<vmem>>, vector<8x128xf32>
    %c0_1 = arith.constant 0 : index
    %c0_2 = arith.constant 0 : index
    %1 = vector.load %arg2[%c0_1, %c0_2] : memref<128x128xf32, #tpu.memory_space<vmem>>, vector<128x128xf32>
    %cst = arith.constant dense<0.000000e+00> : vector<8x128xf32>
    %2 = tpu.matmul %0, %1, %cst {dimension_numbers = #tpu.dot_dimension_numbers<[1], [0], [0], [1], [0, 0, 1, 1], [], []>} : vector<8x128xf32>, vector<128x128xf32>, vector<8x128xf32> -> vector<8x128xf32>
    %c0_3 = arith.constant 0 : index
    %c0_4 = arith.constant 0 : index
    %3 = vector.load %arg3[%c0_3, %c0_4] : memref<1x128xf32, #tpu.memory_space<vmem>>, vector<1x128xf32>
    %4 = vector.broadcast %3 : vector<1x128xf32> to vector<8x128xf32>
    %5 = arith.addf %2, %4 : vector<8x128xf32>
    %c0_5 = arith.constant 0 : index
    %c0_6 = arith.constant 0 : index
    %c0_7 = arith.constant 0 : index
    %6 = vector.load %arg4[%c0_5, %c0_6, %c0_7] : memref<3x128x128xf32, #tpu.memory_space<vmem>>, vector<1x128x128xf32>
    %7 = vector.shape_cast %6 : vector<1x128x128xf32> to vector<128x128xf32>
    %cst_8 = arith.constant dense<0.000000e+00> : vector<8x128xf32>
    %8 = tpu.matmul %5, %7, %cst_8 {dimension_numbers = #tpu.dot_dimension_numbers<[1], [0], [0], [1], [0, 0, 1, 1], [], []>} : vector<8x128xf32>, vector<128x128xf32>, vector<8x128xf32> -> vector<8x128xf32>
    %c0_9 = arith.constant 0 : index
    %c0_10 = arith.constant 0 : index
    %c0_11 = arith.constant 0 : index
    %9 = vector.load %arg5[%c0_9, %c0_10, %c0_11] : memref<3x1x128xf32, #tpu.memory_space<vmem>>, vector<1x1x128xf32>
    %10 = vector.shape_cast %9 : vector<1x1x128xf32> to vector<1x128xf32>
    %11 = vector.broadcast %10 : vector<1x128xf32> to vector<8x128xf32>
    %12 = arith.addf %8, %11 : vector<8x128xf32>
    %cst_12 = arith.constant 0.000000e+00 : f32
    %13 = vector.broadcast %cst_12 : f32 to vector<8x128xf32>
    %14 = arith.maximumf %12, %13 : vector<8x128xf32>
    %15 = arith.addf %14, %5 : vector<8x128xf32>
    %c1 = arith.constant 1 : index
    %c0_13 = arith.constant 0 : index
    %c0_14 = arith.constant 0 : index
    %16 = vector.load %arg4[%c1, %c0_13, %c0_14] : memref<3x128x128xf32, #tpu.memory_space<vmem>>, vector<1x128x128xf32>
    %17 = vector.shape_cast %16 : vector<1x128x128xf32> to vector<128x128xf32>
    %cst_15 = arith.constant dense<0.000000e+00> : vector<8x128xf32>
    %18 = tpu.matmul %15, %17, %cst_15 {dimension_numbers = #tpu.dot_dimension_numbers<[1], [0], [0], [1], [0, 0, 1, 1], [], []>} : vector<8x128xf32>, vector<128x128xf32>, vector<8x128xf32> -> vector<8x128xf32>
    %c1_16 = arith.constant 1 : index
    %c0_17 = arith.constant 0 : index
    %c0_18 = arith.constant 0 : index
    %19 = vector.load %arg5[%c1_16, %c0_17, %c0_18] : memref<3x1x128xf32, #tpu.memory_space<vmem>>, vector<1x1x128xf32>
    %20 = vector.shape_cast %19 : vector<1x1x128xf32> to vector<1x128xf32>
    %21 = vector.broadcast %20 : vector<1x128xf32> to vector<8x128xf32>
    %22 = arith.addf %18, %21 : vector<8x128xf32>
    %cst_19 = arith.constant 0.000000e+00 : f32
    %23 = vector.broadcast %cst_19 : f32 to vector<8x128xf32>
    %24 = arith.maximumf %22, %23 : vector<8x128xf32>
    %25 = arith.addf %24, %15 : vector<8x128xf32>
    %c2 = arith.constant 2 : index
    %c0_20 = arith.constant 0 : index
    %c0_21 = arith.constant 0 : index
    %26 = vector.load %arg4[%c2, %c0_20, %c0_21] : memref<3x128x128xf32, #tpu.memory_space<vmem>>, vector<1x128x128xf32>
    %27 = vector.shape_cast %26 : vector<1x128x128xf32> to vector<128x128xf32>
    %cst_22 = arith.constant dense<0.000000e+00> : vector<8x128xf32>
    %28 = tpu.matmul %25, %27, %cst_22 {dimension_numbers = #tpu.dot_dimension_numbers<[1], [0], [0], [1], [0, 0, 1, 1], [], []>} : vector<8x128xf32>, vector<128x128xf32>, vector<8x128xf32> -> vector<8x128xf32>
    %c2_23 = arith.constant 2 : index
    %c0_24 = arith.constant 0 : index
    %c0_25 = arith.constant 0 : index
    %29 = vector.load %arg5[%c2_23, %c0_24, %c0_25] : memref<3x1x128xf32, #tpu.memory_space<vmem>>, vector<1x1x128xf32>
    %30 = vector.shape_cast %29 : vector<1x1x128xf32> to vector<1x128xf32>
    %31 = vector.broadcast %30 : vector<1x128xf32> to vector<8x128xf32>
    %32 = arith.addf %28, %31 : vector<8x128xf32>
    %cst_26 = arith.constant 0.000000e+00 : f32
    %33 = vector.broadcast %cst_26 : f32 to vector<8x128xf32>
    %34 = arith.maximumf %32, %33 : vector<8x128xf32>
    %35 = arith.addf %34, %25 : vector<8x128xf32>
    %c0_27 = arith.constant 0 : index
    %c0_28 = arith.constant 0 : index
    %36 = vector.load %arg6[%c0_27, %c0_28] : memref<8x128xf32, #tpu.memory_space<vmem>>, vector<8x128xf32>
    tpu.vector_store %arg6[%c0_27, %c0_28], %35 {strides = array<i32>} : memref<8x128xf32, #tpu.memory_space<vmem>>, vector<8x128xf32>,
    return
  }
  func.func @transform_0(%arg0: i32) -> (i32, i32) {
    %c0_i32 = arith.constant 0 : i32
    %c0_i32_0 = arith.constant 0 : i32
    return %arg0, %c0_i32 : i32, i32
  }
  func.func @transform_1(%arg0: i32) -> (i32, i32) {
    %c0_i32 = arith.constant 0 : i32
    %c0_i32_0 = arith.constant 0 : i32
    %c0_i32_1 = arith.constant 0 : i32
    return %c0_i32, %c0_i32_0 : i32, i32
  }
  func.func @transform_2(%arg0: i32) -> (i32, i32) {
    %c0_i32 = arith.constant 0 : i32
    %c0_i32_0 = arith.constant 0 : i32
    %c0_i32_1 = arith.constant 0 : i32
    return %c0_i32, %c0_i32_0 : i32, i32
  }
  func.func @transform_3(%arg0: i32) -> (i32, i32, i32) {
    %c0_i32 = arith.constant 0 : i32
    %c0_i32_0 = arith.constant 0 : i32
    %c0_i32_1 = arith.constant 0 : i32
    %c0_i32_2 = arith.constant 0 : i32
    return %c0_i32, %c0_i32_0, %c0_i32_1 : i32, i32, i32
  }
  func.func @transform_4(%arg0: i32) -> (i32, i32, i32) {
    %c0_i32 = arith.constant 0 : i32
    %c0_i32_0 = arith.constant 0 : i32
    %c0_i32_1 = arith.constant 0 : i32
    %c0_i32_2 = arith.constant 0 : i32
    return %c0_i32, %c0_i32_0, %c0_i32_1 : i32, i32, i32
  }
  func.func @transform_5(%arg0: i32) -> (i32, i32) {
    %c0_i32 = arith.constant 0 : i32
    %c0_i32_0 = arith.constant 0 : i32
    return %arg0, %c0_i32 : i32, i32
  }
}

</mosaic_0001>

<bundles_post_ra>
// kernel: tpu_custom_call.1
= control target key start
LH: loop header
LB: loop body
LE: loop exit
PB: predicated region body
PF: predicated region fallthrough
CT: control target
= control target key end

     0   :  { %10 = vsyncpa [#allocation3], 0  ;;  %s902_s0 = inlined_call_operand.hbm [shape: f32[8,128], index: 0, kind: input, shape index: {}]   ;;  %s903_s1 = inlined_call_operand.hbm [shape: f32[128,128], index: 1, kind: input, shape index: {}]   ;;  %s904_s2 = inlined_call_operand.vmem [shape: f32[1,128], index: 2, kind: input, shape index: {}]   ;;  %s905_s3 = inlined_call_operand.hbm [shape: f32[3,128,128], index: 3, kind: input, shape index: {}]   ;;  %s906_s4 = inlined_call_operand.vmem [shape: f32[3,1,128], index: 4, kind: input, shape index: {}]   ;;  %s907_s5 = inlined_call_operand.hbm [shape: f32[8,128], index: 5, kind: output, shape index: {}]  }
   0x1   :  { %11 = vsyncpa [#allocation6], 0 }
   0x2   :  { %12 = vsyncpa [#allocation4], 0  ;;  %s768_s18 = smov [#allocation5]  }
   0x3   :  { %s28_s19 = sshll.u32 %s768_s18, 4  ;;  %s29_s19 = int_to_ptr.vmem [resolvable:$true] %s28_s19 }
   0x4   :  { %s690_s20 = scalar_lea.vmem %s29_s19, 2048  ;;  %p695_p1 = scmp.lt.s32.totalorder %s29_s19, %s29_s19 }
   0x5   :  { %p691_p0 = scmp.ne.s32.totalorder %s29_s19, %s690_s20  ;;  %p696_p2 = scmp.lt.s32.totalorder %s690_s20, %s690_s20 }
   0x7   :  { %p697_p3 = por %p696_p2, %p695_p1 }
   0x9   :  { %p698_p4 = pnand %p697_p3, %p691_p0 }
   0xb   :  { %701 = shalt.err (!%p698_p4)
}
   0xc   :  { %s769_s21 = smov 128   ;;  %s770_s22 = smov 8  }
   0xd   :  { %34 = dma.hbm_to_vmem [thread:$0]  %s903_s1, 2048, %s29_s19, [#allocation6], %s769_s21, %s769_s21, %s770_s22  }
   0xe   :  { %s771_s25 = smov [#allocation2]   ;;  %s772_s27 = smov [#allocation7]  }
   0xf   :  { %s19_s26 = sshll.u32 %s771_s25, 4  ;;  %s42_s28 = sshll.u32 %s772_s27, 4  ;;  %s20_s26 = int_to_ptr.vmem [resolvable:$true] %s19_s26  ;;  %s43_s28 = int_to_ptr.vmem [resolvable:$true] %s42_s28 }
  0x10   :  { %s710_s29 = scalar_lea.vmem %s20_s26, 128  ;;  %p715_p6 = scmp.lt.s32.totalorder %s20_s26, %s20_s26 }
  0x11   :  { %p711_p5 = scmp.ne.s32.totalorder %s20_s26, %s710_s29  ;;  %p716_p7 = scmp.lt.s32.totalorder %s710_s29, %s710_s29 }
  0x13   :  { %p717_p8 = por %p716_p7, %p715_p6 }
  0x15   :  { %p718_p9 = pnand %p717_p8, %p711_p5 }
  0x17   :  { %721 = shalt.err (!%p718_p9)
}
  0x18   :  { %22 = dma.hbm_to_vmem [thread:$0]  %s902_s0, 128, %s20_s26, [#allocation3]  }
  0x19   :  { %s730_s7 = scalar_lea.vmem %s43_s28, 6144  ;;  %p735_p11 = scmp.lt.s32.totalorder %s43_s28, %s43_s28 }
  0x1a   :  { %p731_p10 = scmp.ne.s32.totalorder %s43_s28, %s730_s7  ;;  %p736_p12 = scmp.lt.s32.totalorder %s730_s7, %s730_s7 }
  0x1c   :  { %p737_p13 = por %p736_p12, %p735_p11 }
  0x1e   :  { %p738_p0 = pnand %p737_p13, %p731_p10 }
  0x20   :  { %741 = shalt.err (!%p738_p0)
}
  0x21   :  { %48 = dma.hbm_to_vmem [thread:$0]  %s905_s3, 6144, %s43_s28, [#allocation6], %s769_s21, %s769_s21, %s770_s22  }
  0x22   :  { %762 = dma.done.wait [#allocation3], 128  }
  0x23   :  { %763 = vsyncadd [#allocation3], 4294967168 }
  0x24   :  { %764 = dma.done.wait [#allocation6], 8192  }
  0x25   :  { %765 = vsyncadd [#allocation6], 4294959104  ;;  %v773_v0 = vmov 0.0   ;;  %vm774_vm0 = vmmov 0   ;;  %v76_v1 = vld [vmem:[#allocation5 + $0x78] sm:$0xff]  ;;  %v75_v2 = vld [vmem:[#allocation5 + $0x70] sm:$0xff] }
  0x26   :  { %534 = vmatprep.subr.mxu0 %v773_v0  ;;  %566 = vmatprep.mubr.msk.f32.mxu0 %vm774_vm0, %v773_v0  ;;  %v74_v3 = vld [vmem:[#allocation5 + $0x68] sm:$0xff]  ;;  %v73_v4 = vld [vmem:[#allocation5 + $0x60] sm:$0xff]  ;;  %v169_v5 = vld [vmem:[#allocation7 + $0x78] sm:$0xff]  ;;  %s775_s14 = smov [#allocation8]  }
  0x27   :  { %569 = vmatprep.subr.mxu1 %v773_v0  ;;  %601 = vmatprep.mubr.msk.f32.mxu1 %vm774_vm0, %v773_v0  ;;  %v72_v6 = vld [vmem:[#allocation5 + $0x58] sm:$0xff]  ;;  %v168_v7 = vld [vmem:[#allocation7 + $0x70] sm:$0xff]  ;;  %v167_v8 = vld [vmem:[#allocation7 + $0x68] sm:$0xff]  ;;  %s450_s15 = sshll.u32 %s775_s14, 4  ;;  %s451_s15 = int_to_ptr.vmem [resolvable:$true] %s450_s15 }
  0x28   :  { %535 = vmatpush3.msra.mxu0 %v76_v1  ;;  %570 = vmatpush3.msra.mxu1 %v169_v5  ;;  %v71_v9 = vld [vmem:[#allocation5 + $0x50] sm:$0xff]  ;;  %v166_v10 = vld [vmem:[#allocation7 + $0x60] sm:$0xff]  ;;  %v70_v11 = vld [vmem:[#allocation5 + $0x48] sm:$0xff]  ;;  %s742_s16 = scalar_lea.vmem %s451_s15, 128  ;;  %p747_p2 = scmp.lt.s32.totalorder %s451_s15, %s451_s15 }
  0x29   :  { %536 = vmatprep.subr.mxu0 %v773_v0  ;;  %571 = vmatprep.subr.mxu1 %v773_v0  ;;  %v165_v12 = vld [vmem:[#allocation7 + $0x58] sm:$0xff]  ;;  %v69_v13 = vld [vmem:[#allocation5 + $0x40] sm:$0xff]  ;;  %v164_v14 = vld [vmem:[#allocation7 + $0x50] sm:$0xff]  ;;  %p743_p1 = scmp.ne.s32.totalorder %s451_s15, %s742_s16  ;;  %p748_p3 = scmp.lt.s32.totalorder %s742_s16, %s742_s16 }
  0x2a   :  { %537 = vmatpush3.msra.mxu0 %v75_v2  ;;  %572 = vmatpush3.msra.mxu1 %v168_v7  ;;  %v68_v15 = vld [vmem:[#allocation5 + $0x38] sm:$0xff]  ;;  %v163_v16 = vld [vmem:[#allocation7 + $0x48] sm:$0xff]  ;;  %v67_v17 = vld [vmem:[#allocation5 + $0x30] sm:$0xff] }
  0x2b   :  { %538 = vmatprep.subr.mxu0 %v773_v0  ;;  %573 = vmatprep.subr.mxu1 %v773_v0  ;;  %v162_v18 = vld [vmem:[#allocation7 + $0x40] sm:$0xff]  ;;  %v66_v19 = vld [vmem:[#allocation5 + $0x28] sm:$0xff]  ;;  %v161_v20 = vld [vmem:[#allocation7 + $0x38] sm:$0xff]  ;;  %p749_p4 = por %p748_p3, %p747_p2 }
  0x2c   :  { %539 = vmatpush3.msra.mxu0 %v74_v3  ;;  %574 = vmatpush3.msra.mxu1 %v167_v8  ;;  %v65_v21 = vld [vmem:[#allocation5 + $0x20] sm:$0xff]  ;;  %v160_v22 = vld [vmem:[#allocation7 + $0x30] sm:$0xff]  ;;  %v64_v23 = vld [vmem:[#allocation5 + $0x18] sm:$0xff] }
  0x2d   :  { %540 = vmatprep.subr.mxu0 %v773_v0  ;;  %575 = vmatprep.subr.mxu1 %v773_v0  ;;  %v159_v24 = vld [vmem:[#allocation7 + $0x28] sm:$0xff]  ;;  %v63_v25 = vld [vmem:[#allocation5 + $0x10] sm:$0xff]  ;;  %v158_v26 = vld [vmem:[#allocation7 + $0x20] sm:$0xff]  ;;  %p750_p5 = pnand %p749_p4, %p743_p1 }
  0x2e   :  { %541 = vmatpush3.msra.mxu0 %v73_v4  ;;  %576 = vmatpush3.msra.mxu1 %v166_v10  ;;  %v62_v27 = vld [vmem:[#allocation5 + $0x8] sm:$0xff]  ;;  %v157_v28 = vld [vmem:[#allocation7 + $0x18] sm:$0xff]  ;;  %v61_v29 = vld [vmem:[#allocation5] sm:$0xff] }
  0x2f   :  { %542 = vmatprep.subr.mxu0 %v773_v0  ;;  %577 = vmatprep.subr.mxu1 %v773_v0  ;;  %v60_v30 = vld [vmem:[#allocation2] sm:$0xff]  ;;  %v156_v31 = vld [vmem:[#allocation7 + $0x10] sm:$0xff]  ;;  %v155_v32 = vld [vmem:[#allocation7 + $0x8] sm:$0xff] }
  0x30   :  { %543 = vmatpush3.msra.mxu0 %v72_v6  ;;  %578 = vmatpush3.msra.mxu1 %v165_v12  ;;  %v154_v33 = vld [vmem:[#allocation7] sm:$0xff]  ;;  %v265_v34 = vld [vmem:[#allocation7 + $0xf8] sm:$0xff]  ;;  %v264_v35 = vld [vmem:[#allocation7 + $0xf0] sm:$0xff] }
  0x31   :  { %544 = vmatprep.subr.mxu0 %v773_v0  ;;  %579 = vmatprep.subr.mxu1 %v773_v0  ;;  %v263_v36 = vld [vmem:[#allocation7 + $0xe8] sm:$0xff]  ;;  %v262_v37 = vld [vmem:[#allocation7 + $0xe0] sm:$0xff]  ;;  %v261_v38 = vld [vmem:[#allocation7 + $0xd8] sm:$0xff] }
  0x32   :  { %545 = vmatpush3.msra.mxu0 %v71_v9  ;;  %580 = vmatpush3.msra.mxu1 %v164_v14  ;;  %v260_v39 = vld [vmem:[#allocation7 + $0xd0] sm:$0xff]  ;;  %v259_v40 = vld [vmem:[#allocation7 + $0xc8] sm:$0xff]  ;;  %v258_v41 = vld [vmem:[#allocation7 + $0xc0] sm:$0xff] }
  0x33   :  { %546 = vmatprep.subr.mxu0 %v773_v0  ;;  %581 = vmatprep.subr.mxu1 %v773_v0  ;;  %v257_v42 = vld [vmem:[#allocation7 + $0xb8] sm:$0xff]  ;;  %v256_v43 = vld [vmem:[#allocation7 + $0xb0] sm:$0xff]  ;;  %v255_v44 = vld [vmem:[#allocation7 + $0xa8] sm:$0xff] }
  0x34   :  { %547 = vmatpush3.msra.mxu0 %v70_v11  ;;  %582 = vmatpush3.msra.mxu1 %v163_v16  ;;  %v254_v45 = vld [vmem:[#allocation7 + $0xa0] sm:$0xff]  ;;  %v460_v46 = vld [vmem:[%s904_s2] ss:$0 sm:$0xff]  ;;  %v252_v51 = vld [vmem:[#allocation7 + $0x90] sm:$0xff] }
  0x35   :  { %548 = vmatprep.subr.mxu0 %v773_v0  ;;  %583 = vmatprep.subr.mxu1 %v773_v0  ;;  %v253_v50 = vld [vmem:[#allocation7 + $0x98] sm:$0xff]  ;;  %v251_v52 = vld [vmem:[#allocation7 + $0x88] sm:$0xff]  ;;  %v250_v53 = vld [vmem:[#allocation7 + $0x80] sm:$0xff] }
  0x36   :  { %549 = vmatpush3.msra.mxu0 %v69_v13  ;;  %584 = vmatpush3.msra.mxu1 %v162_v18  ;;  %v362_v54 = vld [vmem:[#allocation7 + $0x178] sm:$0xff]  ;;  %v361_v55 = vld [vmem:[#allocation7 + $0x170] sm:$0xff]  ;;  %v360_v56 = vld [vmem:[#allocation7 + $0x168] sm:$0xff] }
  0x37   :  { %550 = vmatprep.subr.mxu0 %v773_v0  ;;  %585 = vmatprep.subr.mxu1 %v773_v0  ;;  %v359_v57 = vld [vmem:[#allocation7 + $0x160] sm:$0xff]  ;;  %v358_v58 = vld [vmem:[#allocation7 + $0x158] sm:$0xff]  ;;  %v357_v59 = vld [vmem:[#allocation7 + $0x150] sm:$0xff] }
  0x38   :  { %551 = vmatpush3.msra.mxu0 %v68_v15  ;;  %586 = vmatpush3.msra.mxu1 %v161_v20  ;;  %v356_v60 = vld [vmem:[#allocation7 + $0x148] sm:$0xff]  ;;  %v355_v61 = vld [vmem:[#allocation7 + $0x140] sm:$0xff]  ;;  %v354_v62 = vld [vmem:[#allocation7 + $0x138] sm:$0xff] }
  0x39   :  { %552 = vmatprep.subr.mxu0 %v773_v0  ;;  %587 = vmatprep.subr.mxu1 %v773_v0  ;;  %v353_v63 = vld [vmem:[#allocation7 + $0x130] sm:$0xff]  ;;  %v352_v1 = vld [vmem:[#allocation7 + $0x128] sm:$0xff]  ;;  %v351_v2 = vld [vmem:[#allocation7 + $0x120] sm:$0xff] }
  0x3a   :  { %553 = vmatpush3.msra.mxu0 %v67_v17  ;;  %588 = vmatpush3.msra.mxu1 %v160_v22  ;;  %v461_v3 = vld [vmem:[%s906_s4] ss:$0 sm:$0xff]  ;;  %v349_v10 = vld [vmem:[#allocation7 + $0x110] sm:$0xff]  ;;  %v348_v11 = vld [vmem:[#allocation7 + $0x108] sm:$0xff] }
  0x3b   :  { %554 = vmatprep.subr.mxu0 %v773_v0  ;;  %589 = vmatprep.subr.mxu1 %v773_v0  ;;  %v350_v9 = vld [vmem:[#allocation7 + $0x118] sm:$0xff]  ;;  %v347_v12 = vld [vmem:[#allocation7 + $0x100] sm:$0xff] }
  0x3c   :  { %555 = vmatpush3.msra.mxu0 %v66_v19  ;;  %590 = vmatpush3.msra.mxu1 %v159_v24  ;;  %v463_v13 = vld [vmem:[%s906_s4 + $0x1] ss:$0 sm:$0xff]  ;;  %v465_v19 = vld [vmem:[%s906_s4 + $0x2] ss:$0 sm:$0xff] }
  0x3d   :  { %556 = vmatprep.subr.mxu0 %v773_v0  ;;  %591 = vmatprep.subr.mxu1 %v773_v0 }
  0x3e   :  { %557 = vmatpush3.msra.mxu0 %v65_v21  ;;  %592 = vmatpush3.msra.mxu1 %v158_v26 }
  0x3f   :  { %558 = vmatprep.subr.mxu0 %v773_v0  ;;  %593 = vmatprep.subr.mxu1 %v773_v0 }
  0x40   :  { %559 = vmatpush3.msra.mxu0 %v64_v23  ;;  %594 = vmatpush3.msra.mxu1 %v157_v28 }
  0x41   :  { %560 = vmatprep.subr.mxu0 %v773_v0  ;;  %595 = vmatprep.subr.mxu1 %v773_v0 }
  0x42   :  { %561 = vmatpush3.msra.mxu0 %v63_v25  ;;  %596 = vmatpush3.msra.mxu1 %v156_v31 }
  0x43   :  { %562 = vmatprep.subr.mxu0 %v773_v0  ;;  %597 = vmatprep.subr.mxu1 %v773_v0 }
  0x44   :  { %563 = vmatpush3.msra.mxu0 %v62_v27  ;;  %598 = vmatpush3.msra.mxu1 %v155_v32 }
  0x45   :  { %564 = vmatprep.subr.mxu0 %v773_v0  ;;  %599 = vmatprep.subr.mxu1 %v773_v0 }
  0x46   :  { %565 = vmatpush3.msra.mxu0 %v61_v29  ;;  %600 = vmatpush3.msra.mxu1 %v154_v33 }
  0x47   :  { %567 = vmatmul.mubr.f32.vlgmr.msra.gmra.mxu0 %v60_v30  ;;  %604 = vmatprep.subr.mxu0 %v773_v0 }
  0x48   :  { %636 = vmatprep.mubr.msk.f32.mxu0 %vm774_vm0, %v773_v0  ;;  %639 = vmatprep.subr.mxu1 %v773_v0 }
  0x49   :  { %605 = vmatpush3.msra.mxu0 %v265_v34 }
  0x4a   :  { %606 = vmatprep.subr.mxu0 %v773_v0 }
  0x4b   :  { %607 = vmatpush3.msra.mxu0 %v264_v35 }
  0x4c   :  { %608 = vmatprep.subr.mxu0 %v773_v0 }
  0x4d   :  { %609 = vmatpush3.msra.mxu0 %v263_v36 }
  0x4e   :  { %610 = vmatprep.subr.mxu0 %v773_v0 }
  0x4f   :  { %611 = vmatpush3.msra.mxu0 %v262_v37 }
  0x50   :  { %612 = vmatprep.subr.mxu0 %v773_v0 }
  0x51   :  { %613 = vmatpush3.msra.mxu0 %v261_v38 }
  0x52   :  { %614 = vmatprep.subr.mxu0 %v773_v0 }
  0x53   :  { %615 = vmatpush3.msra.mxu0 %v260_v39 }
  0x54   :  { %616 = vmatprep.subr.mxu0 %v773_v0 }
  0x55   :  { %617 = vmatpush3.msra.mxu0 %v259_v40 }
  0x56   :  { %618 = vmatprep.subr.mxu0 %v773_v0 }
  0x57   :  { %619 = vmatpush3.msra.mxu0 %v258_v41 }
  0x58   :  { %620 = vmatprep.subr.mxu0 %v773_v0 }
  0x59   :  { %621 = vmatpush3.msra.mxu0 %v257_v42 }
  0x5a   :  { %622 = vmatprep.subr.mxu0 %v773_v0 }
  0x5b   :  { %623 = vmatpush3.msra.mxu0 %v256_v43 }
  0x5c   :  { %624 = vmatprep.subr.mxu0 %v773_v0 }
  0x5d   :  { %625 = vmatpush3.msra.mxu0 %v255_v44 }
  0x5e   :  { %626 = vmatprep.subr.mxu0 %v773_v0 }
  0x5f   :  { %627 = vmatpush3.msra.mxu0 %v254_v45 }
  0x60   :  { %628 = vmatprep.subr.mxu0 %v773_v0 }
  0x61   :  { %629 = vmatpush3.msra.mxu0 %v253_v50 }
  0x62   :  { %630 = vmatprep.subr.mxu0 %v773_v0 }
  0x63   :  { %631 = vmatpush3.msra.mxu0 %v252_v51 }
  0x64   :  { %632 = vmatprep.subr.mxu0 %v773_v0 }
  0x65   :  { %633 = vmatpush3.msra.mxu0 %v251_v52 }
  0x66   :  { %634 = vmatprep.subr.mxu0 %v773_v0 }
  0x67   :  { %635 = vmatpush3.msra.mxu0 %v250_v53 }
 0x107   :  { %v150_v47 = vpop.f32.mrf.mxu0 }
 0x108   :  { %v151_v48 = vadd.f32 %v460_v46, %v150_v47 }
 0x109   :  { %v568_v49 = vpop.f32.mrf.mxu0 }
 0x10a   :  { %602 = vmatmul.mubr.f32.vlgmr.msra.gmra.mxu1 %v151_v48 }
 0x10b   :  { %671 = vmatprep.mubr.msk.f32.mxu1 %vm774_vm0, %v773_v0  ;;  %640 = vmatpush3.msra.mxu1 %v362_v54 }
 0x10c   :  { %641 = vmatprep.subr.mxu1 %v773_v0 }
 0x10d   :  { %642 = vmatpush3.msra.mxu1 %v361_v55 }
 0x10e   :  { %643 = vmatprep.subr.mxu1 %v773_v0 }
 0x10f   :  { %644 = vmatpush3.msra.mxu1 %v360_v56 }
 0x110   :  { %645 = vmatprep.subr.mxu1 %v773_v0 }
 0x111   :  { %646 = vmatpush3.msra.mxu1 %v359_v57 }
 0x112   :  { %647 = vmatprep.subr.mxu1 %v773_v0 }
 0x113   :  { %648 = vmatpush3.msra.mxu1 %v358_v58 }
 0x114   :  { %649 = vmatprep.subr.mxu1 %v773_v0 }
 0x115   :  { %650 = vmatpush3.msra.mxu1 %v357_v59 }
 0x116   :  { %651 = vmatprep.subr.mxu1 %v773_v0 }
 0x117   :  { %652 = vmatpush3.msra.mxu1 %v356_v60 }
 0x118   :  { %653 = vmatprep.subr.mxu1 %v773_v0 }
 0x119   :  { %654 = vmatpush3.msra.mxu1 %v355_v61 }
 0x11a   :  { %655 = vmatprep.subr.mxu1 %v773_v0 }
 0x11b   :  { %656 = vmatpush3.msra.mxu1 %v354_v62 }
 0x11c   :  { %657 = vmatprep.subr.mxu1 %v773_v0 }
 0x11d   :  { %658 = vmatpush3.msra.mxu1 %v353_v63 }
 0x11e   :  { %659 = vmatprep.subr.mxu1 %v773_v0 }
 0x11f   :  { %660 = vmatpush3.msra.mxu1 %v352_v1 }
 0x120   :  { %661 = vmatprep.subr.mxu1 %v773_v0 }
 0x121   :  { %662 = vmatpush3.msra.mxu1 %v351_v2 }
 0x122   :  { %663 = vmatprep.subr.mxu1 %v773_v0 }
 0x123   :  { %664 = vmatpush3.msra.mxu1 %v350_v9 }
 0x124   :  { %665 = vmatprep.subr.mxu1 %v773_v0 }
 0x125   :  { %666 = vmatpush3.msra.mxu1 %v349_v10 }
 0x126   :  { %667 = vmatprep.subr.mxu1 %v773_v0 }
 0x127   :  { %668 = vmatpush3.msra.mxu1 %v348_v11 }
 0x128   :  { %669 = vmatprep.subr.mxu1 %v773_v0 }
 0x129   :  { %670 = vmatpush3.msra.mxu1 %v347_v12 }
 0x1ca   :  { %v243_v4 = vpop.f32.mrf.mxu1 }
 0x1cb   :  { %v244_v5 = vadd.f32 %v461_v3, %v243_v4 }
 0x1cc   :  { %v603_v6 = vpop.f32.mrf.mxu1 }
 0x1cd   :  { %v247_v7 = vmax.f32 %v244_v5, 0.0 }
 0x1cf   :  { %v248_v8 = vadd.f32 %v247_v7, %v151_v48 }
 0x1d1   :  { %637 = vmatmul.mubr.f32.vlgmr.msra.gmra.mxu0 %v248_v8 }
 0x291   :  { %v340_v14 = vpop.f32.mrf.mxu0 }
 0x292   :  { %v341_v15 = vadd.f32 %v463_v13, %v340_v14 }
 0x293   :  { %v638_v16 = vpop.f32.mrf.mxu0 }
 0x294   :  { %v344_v17 = vmax.f32 %v341_v15, 0.0 }
 0x296   :  { %v345_v18 = vadd.f32 %v344_v17, %v248_v8 }
 0x298   :  { %672 = vmatmul.mubr.f32.vlgmr.msra.gmra.mxu1 %v345_v18 }
 0x358   :  { %v437_v20 = vpop.f32.mrf.mxu1 }
 0x359   :  { %v438_v21 = vadd.f32 %v465_v19, %v437_v20 }
 0x35a   :  { %v673_v22 = vpop.f32.mrf.mxu1 }
 0x35b   :  { %v441_v0 = vmax.f32 %v438_v21, 0.0 }
 0x35d   :  { %v442_v23 = vadd.f32 %v441_v0, %v345_v18 }
 0x35f   :  { %443 = vst [vmem:[#allocation8] sm:$0xff] %v442_v23 }
 0x360   :  { %753 = shalt.err (!%p750_p5)
}
 0x361   :  { %453 = dma.vmem_to_hbm [thread:$0]  %s451_s15, 128, %s907_s5, [#allocation4]  }
 0x362   :  { %766 = dma.done.wait [#allocation4], 128  }
 0x363   :  { %767 = vsyncadd [#allocation4], 4294967168 }
 0x364   :  { %457 = vsyncpa [#allocation3], 1 }
 0x365   :  { %458 = vsyncpa [#allocation6], 1 }
 0x366   :  { %459 = vsyncpa [#allocation4], 1 }

</bundles_post_ra>
